<compile_context>
chip_gen: v7x
topology: tpu7x:2x2x1
jax: 0.10.0
libtpu: 0.0.40
codegen_flags: <defaults>
</compile_context>

<pallas_src>
import math
import numpy as np
import jax
import jax.numpy as jnp
from jax.experimental import pallas as pl
from jax.experimental.pallas import tpu as pltpu


def _round_up(x, m):
    return (x + m - 1) // m * m


# ------------------------------------------------------------------ kernel ---
def gcn_sum_kernel(a_ref, x_ref, w_ref, b_ref, o_ref, acc_ref):
    """grid = (dst_tiles, src_tiles); the src (reduction) axis is innermost.

    a_ref  : (TM, TK) bf16  normalized adjacency tile A_hat[i-tile, k-tile]
    x_ref  : (TK, Fp) bf16  node-feature tile (source rows)
    w_ref  : (Fp, Op) bf16  linear weight, pre-transposed + zero-padded
    b_ref  : (1, Op)  f32   linear bias, zero-padded
    o_ref  : (TM, Op) f32   output tile
    acc_ref: (TM, Fp) f32   aggregated-feature accumulator (VMEM scratch)
    """
    k = pl.program_id(1)

    @pl.when(k == 0)
    def _():
        acc_ref[...] = jnp.zeros_like(acc_ref)

    # aggregation: acc += A_hat_tile @ feat_tile  (MXU, f32 accumulate)
    acc_ref[...] += jnp.dot(a_ref[...], x_ref[...],
                            preferred_element_type=jnp.float32)

    # fused epilogue on the last reduction step: linear layer, lane-dense store
    @pl.when(k == pl.num_programs(1) - 1)
    def _():
        o_ref[...] = (jnp.dot(acc_ref[...].astype(w_ref.dtype), w_ref[...],
                              preferred_element_type=jnp.float32)
                      + b_ref[...]).astype(o_ref.dtype)


# ----------------------------------------------------------------- wrapper ---
def gcn_layer_forward(feat, nbrs, params, *, tile=256):
    """feat: (N, F) f32, nbrs: (N, D) i32 in-neighbor table; params: w (O, F), b (O,)."""
    N, F = feat.shape
    D = nbrs.shape[1]
    O = params["w"].shape[0]

    # ------------- graph glue (degrees, normalization, adjacency) in plain JAX -------------
    src = nbrs.reshape(-1).astype(jnp.int32)                  # (N*D,)
    dst = jnp.repeat(jnp.arange(N, dtype=jnp.int32), D)       # (N*D,)
    in_deg = jnp.zeros((N,), jnp.float32).at[dst].add(1.0)
    out_deg = jnp.zeros((N,), jnp.float32).at[src].add(1.0)
    in_norm = jnp.sqrt(in_deg)
    out_norm = jnp.sqrt(out_deg)

    # pad node / feature / output dims: (8,128)-aligned blocks, lane-dense output, no tail drop
    Np = _round_up(N, tile)
    Fp = _round_up(F, 128)
    Op = _round_up(O, 128)

    # normalized adjacency: A_hat[i, j] = (#edges j->i) / (in_norm[i] * out_norm[j])
    # (both degree normalizations folded in here -> no divides inside the kernel)
    edge_w = 1.0 / (in_norm[dst] * out_norm[src])
    a_hat = jnp.zeros((Np, Np), jnp.float32).at[dst, src].add(edge_w)

    x = jnp.zeros((Np, Fp), jnp.float32).at[:N, :F].set(feat)
    w_t = jnp.zeros((Fp, Op), jnp.float32).at[:F, :O].set(params["w"].T)
    b = jnp.zeros((1, Op), jnp.float32).at[0, :O].set(params["b"])

    # bf16 matmul inputs (f32 accumulation inside the kernel)
    a_hat = a_hat.astype(jnp.bfloat16)
    x = x.astype(jnp.bfloat16)
    w_t = w_t.astype(jnp.bfloat16)

    grid = (Np // tile, Np // tile)
    out = pl.pallas_call(
        gcn_sum_kernel,
        out_shape=jax.ShapeDtypeStruct((Np, Op), jnp.float32),
        grid_spec=pltpu.PrefetchScalarGridSpec(
            num_scalar_prefetch=0,
            grid=grid,
            in_specs=[
                pl.BlockSpec((tile, tile), lambda i, k: (i, k)),   # A_hat tile
                pl.BlockSpec((tile, Fp), lambda i, k: (k, 0)),     # feat tile
                pl.BlockSpec((Fp, Op), lambda i, k: (0, 0)),       # W^T (padded)
                pl.BlockSpec((1, Op), lambda i, k: (0, 0)),        # bias (padded)
            ],
            out_specs=pl.BlockSpec((tile, Op), lambda i, k: (i, 0)),
            scratch_shapes=[pltpu.VMEM((tile, Fp), jnp.float32)],
        ),
        compiler_params=pltpu.CompilerParams(
            dimension_semantics=("parallel", "arbitrary")),
    )(a_hat, x, w_t, b)

    return out[:N, :O]


# --------------------------------------------------------------- reference ---
def reference_forward(feat, nbrs, params):
    """Literal DGL semantics: copy_u -> sum, degree-normalized, then Linear (all f32)."""
    N, F = feat.shape
    D = nbrs.shape[1]
    src = nbrs.reshape(-1)
    dst = jnp.repeat(jnp.arange(N), D)
    in_deg = jnp.zeros((N,), jnp.float32).at[dst].add(1.0)
    out_deg = jnp.zeros((N,), jnp.float32).at[src].add(1.0)
    in_norm = jnp.sqrt(in_deg)[:, None]
    out_norm = jnp.sqrt(out_deg)[:, None]
    h_src = feat / out_norm
    agg = jnp.zeros((N, F), jnp.float32).at[dst].add(h_src[src])   # copy_u -> sum
    return (agg / in_norm) @ params["w"].T + params["b"]


# -------------------------------------------------------------------- main ---
if __name__ == "__main__":
    N, D, IN_FEATS, OUT_FEATS = 512, 8, 128, 32
    TILE = 256   # 256x256 adjacency tiles -> grid (2, 2): MXU-sized, both v7x TCs busy

    key = jax.random.PRNGKey(0)
    k_feat, k_w, k_b = jax.random.split(key, 3)

    feat = jax.random.normal(k_feat, (N, IN_FEATS), dtype=jnp.float32)

    # deterministic fixed-degree in-neighbor table: node i's in-neighbors are i+1 .. i+D (mod N)
    nbrs = ((jnp.arange(N)[:, None] + jnp.arange(1, D + 1)[None, :]) % N).astype(jnp.int32)

    # parameter init matching the module's reset_parameters()
    stdv = 1.0 / math.sqrt(IN_FEATS)
    params = {
        "w": jax.random.uniform(k_w, (OUT_FEATS, IN_FEATS), jnp.float32, -stdv, stdv),
        "b": jax.random.uniform(k_b, (OUT_FEATS,), jnp.float32, -stdv, stdv),
    }

    out = jax.block_until_ready(gcn_layer_forward(feat, nbrs, params, tile=TILE))
    ref = jax.block_until_ready(reference_forward(feat, nbrs, params))
    np.testing.assert_allclose(np.asarray(out), np.asarray(ref), rtol=2e-2, atol=2e-2)

    # TODO(synk): training/use_pp=True branch (plain linear, no aggregation) and the
    # torch.autograd.graph.save_on_cpu() / CUDA memory-logging context have no Pallas-forward
    # equivalent; only the aggregation + linear eval-path forward is implemented.
    # TODO(synk): for very large sparse graphs, replace the dense blocked A_hat with a gathered
    # SpMM (scalar-prefetched CSR indices + manual DMA of source-row tiles from HBM).
    print("KERNEL_OK")
</pallas_src>

<mosaic_0001>
module attributes {stable_mosaic.version = 11 : i64} {
  func.func @gcn_sum_kernel(%arg0: i32, %arg1: i32, %arg2: memref<256x256xbf16, #tpu.memory_space<vmem>>, %arg3: memref<256x128xbf16, #tpu.memory_space<vmem>>, %arg4: memref<128x128xbf16, #tpu.memory_space<vmem>>, %arg5: memref<1x128xf32, #tpu.memory_space<vmem>>, %arg6: memref<256x128xf32, #tpu.memory_space<vmem>>, %arg7: memref<256x128xf32, #tpu.memory_space<vmem>>) attributes {dimension_semantics = [#tpu.dimension_semantics<parallel>, #tpu.dimension_semantics<arbitrary>], iteration_bounds = array<i64: 2, 2>, scalar_prefetch = 0 : i64, scratch_operands = 1 : i64, tpu.core_type = #tpu.core_type<tc>, window_params = [{transform_indices = @transform_0, window_bounds = array<i64: 256, 256>}, {transform_indices = @transform_1, window_bounds = array<i64: 256, 128>}, {pipeline_mode = #tpu.pipeline_mode<synchronous>, transform_indices = @transform_2, window_bounds = array<i64: 128, 128>}, {pipeline_mode = #tpu.pipeline_mode<synchronous>, transform_indices = @transform_3, window_bounds = array<i64: 1, 128>}, {transform_indices = @transform_4, window_bounds = array<i64: 256, 128>}]} {
    %c0_i32 = arith.constant 0 : i32
    %0 = arith.cmpi eq, %arg1, %c0_i32 : i32
    %1 = arith.extui %0 : i1 to i32
    %c0_i32_0 = arith.constant 0 : i32
    %2 = arith.cmpi ne, %1, %c0_i32_0 : i32
    scf.if %2 {
      %cst_9 = arith.constant 0.000000e+00 : f32
      %12 = vector.broadcast %cst_9 : f32 to vector<256x128xf32>
      %c0_10 = arith.constant 0 : index
      %c0_11 = arith.constant 0 : index
      %13 = vector.load %arg7[%c0_10, %c0_11] : memref<256x128xf32, #tpu.memory_space<vmem>>, vector<256x128xf32>
      tpu.vector_store %arg7[%c0_10, %c0_11], %12 {strides = array<i32>} : memref<256x128xf32, #tpu.memory_space<vmem>>, vector<256x128xf32>,
    } else {
    }
    %c0 = arith.constant 0 : index
    %c0_1 = arith.constant 0 : index
    %3 = vector.load %arg7[%c0, %c0_1] : memref<256x128xf32, #tpu.memory_space<vmem>>, vector<256x128xf32>
    %c0_2 = arith.constant 0 : index
    %c0_3 = arith.constant 0 : index
    %4 = vector.load %arg2[%c0_2, %c0_3] : memref<256x256xbf16, #tpu.memory_space<vmem>>, vector<256x256xbf16>
    %c0_4 = arith.constant 0 : index
    %c0_5 = arith.constant 0 : index
    %5 = vector.load %arg3[%c0_4, %c0_5] : memref<256x128xbf16, #tpu.memory_space<vmem>>, vector<256x128xbf16>
    %cst = arith.constant dense<0.000000e+00> : vector<256x128xf32>
    %6 = tpu.matmul %4, %5, %cst {dimension_numbers = #tpu.dot_dimension_numbers<[1], [0], [0], [1], [0, 0, 1, 1], [], []>} : vector<256x256xbf16>, vector<256x128xbf16>, vector<256x128xf32> -> vector<256x128xf32>
    %7 = arith.addf %3, %6 : vector<256x128xf32>
    %c0_6 = arith.constant 0 : index
    %c0_7 = arith.constant 0 : index
    %8 = vector.load %arg7[%c0_6, %c0_7] : memref<256x128xf32, #tpu.memory_space<vmem>>, vector<256x128xf32>
    tpu.vector_store %arg7[%c0_6, %c0_7], %7 {strides = array<i32>} : memref<256x128xf32, #tpu.memory_space<vmem>>, vector<256x128xf32>,
    %c1_i32 = arith.constant 1 : i32
    %9 = arith.cmpi eq, %arg1, %c1_i32 : i32
    %10 = arith.extui %9 : i1 to i32
    %c0_i32_8 = arith.constant 0 : i32
    %11 = arith.cmpi ne, %10, %c0_i32_8 : i32
    scf.if %11 {
      %c0_9 = arith.constant 0 : index
      %c0_10 = arith.constant 0 : index
      %12 = vector.load %arg7[%c0_9, %c0_10] : memref<256x128xf32, #tpu.memory_space<vmem>>, vector<256x128xf32>
      %13 = arith.truncf %12 : vector<256x128xf32> to vector<256x128xbf16>
      %c0_11 = arith.constant 0 : index
      %c0_12 = arith.constant 0 : index
      %14 = vector.load %arg4[%c0_11, %c0_12] : memref<128x128xbf16, #tpu.memory_space<vmem>>, vector<128x128xbf16>
      %cst_13 = arith.constant dense<0.000000e+00> : vector<256x128xf32>
      %15 = tpu.matmul %13, %14, %cst_13 {dimension_numbers = #tpu.dot_dimension_numbers<[1], [0], [0], [1], [0, 0, 1, 1], [], []>} : vector<256x128xbf16>, vector<128x128xbf16>, vector<256x128xf32> -> vector<256x128xf32>
      %c0_14 = arith.constant 0 : index
      %c0_15 = arith.constant 0 : index
      %16 = vector.load %arg5[%c0_14, %c0_15] : memref<1x128xf32, #tpu.memory_space<vmem>>, vector<1x128xf32>
      %17 = vector.broadcast %16 : vector<1x128xf32> to vector<256x128xf32>
      %18 = arith.addf %15, %17 : vector<256x128xf32>
      %c0_16 = arith.constant 0 : index
      %c0_17 = arith.constant 0 : index
      %19 = vector.load %arg6[%c0_16, %c0_17] : memref<256x128xf32, #tpu.memory_space<vmem>>, vector<256x128xf32>
      tpu.vector_store %arg6[%c0_16, %c0_17], %18 {strides = array<i32>} : memref<256x128xf32, #tpu.memory_space<vmem>>, vector<256x128xf32>,
    } else {
    }
    return
  }
  func.func @transform_0(%arg0: i32, %arg1: i32) -> (i32, i32) {
    %c0_i32 = arith.constant 0 : i32
    return %arg0, %arg1 : i32, i32
  }
  func.func @transform_1(%arg0: i32, %arg1: i32) -> (i32, i32) {
    %c0_i32 = arith.constant 0 : i32
    %c0_i32_0 = arith.constant 0 : i32
    return %arg1, %c0_i32 : i32, i32
  }
  func.func @transform_2(%arg0: i32, %arg1: i32) -> (i32, i32) {
    %c0_i32 = arith.constant 0 : i32
    %c0_i32_0 = arith.constant 0 : i32
    %c0_i32_1 = arith.constant 0 : i32
    return %c0_i32, %c0_i32_0 : i32, i32
  }
  func.func @transform_3(%arg0: i32, %arg1: i32) -> (i32, i32) {
    %c0_i32 = arith.constant 0 : i32
    %c0_i32_0 = arith.constant 0 : i32
    %c0_i32_1 = arith.constant 0 : i32
    return %c0_i32, %c0_i32_0 : i32, i32
  }
  func.func @transform_4(%arg0: i32, %arg1: i32) -> (i32, i32) {
    %c0_i32 = arith.constant 0 : i32
    %c0_i32_0 = arith.constant 0 : i32
    return %arg0, %c0_i32 : i32, i32
  }
}

</mosaic_0001>

<bundles_post_ra>
// kernel: tpu_custom_call.1
= control target key start
LH: loop header
LB: loop body
LE: loop exit
PB: predicated region body
PF: predicated region fallthrough
CT: control target
= control target key end

     0   :  { %s2659_s0 = inlined_call_operand.hbm [shape: bf16[512,512], index: 0, kind: input, shape index: {}]   ;;  %s2660_s1 = inlined_call_operand.hbm [shape: bf16[512,128], index: 1, kind: input, shape index: {}]   ;;  %s2661_s2 = inlined_call_operand.hbm [shape: bf16[128,128], index: 2, kind: input, shape index: {}]   ;;  %s2662_s3 = inlined_call_operand.vmem [shape: f32[1,128], index: 3, kind: input, shape index: {}]   ;;  %s2663_s4 = inlined_call_operand.hbm [shape: f32[512,128], index: 4, kind: output, shape index: {}]  }
   0x1   :  { %2686 = sst [smem:[#allocation24_spill]] %s2661_s2 }
   0x2   :  { %2687 = sst [smem:[#allocation25_spill]] %s2662_s3 }
   0x3   :  { %2688 = sst [smem:[#allocation26_spill]] %s2663_s4 }
   0x4   :  { %9 = vsyncpa [#allocation4], 0 }
   0x5   :  { %11 = vsyncpa [#allocation4 + $0x1], 0 }
   0x6   :  { %12 = vsyncpa [#allocation7], 0 }
   0x7   :  { %14 = vsyncpa [#allocation7 + $0x1], 0 }
   0x8   :  { %15 = vsyncpa [#allocation5], 0 }
   0x9   :  { %17 = vsyncpa [#allocation5 + $0x1], 0  ;;  %s2158_s15 = smov 0   ;;  %s2160_s16 = smov 0  }
   0xa   :  { %s2162_s17 = smov 0   ;;  %s2164_s18 = smov 0  }
   0xb   :  { %s2166_s19 = smov 0   ;;  %s2168_s20 = smov 0  }
   0xc   :  { %s2170_s21 = smov 0   ;;  %s2172_s22 = smov 0  }
   0xd   :  { %s2174_s23 = smov 0   ;;  %s2176_s24 = smov 0  }
   0xe   :  { %s2178_s25 = smov 0   ;;  %s2180_s26 = smov 0  }
   0xf   :  { %s2182_s27 = smov 0   ;;  %s2184_s28 = smov 0  }
  0x10 LB: > { %2689 = sst [smem:[#allocation14_spill]] %s2067_s15  ;;  %s2225_s29 = sadd.s32 4294967295, %s2119_s28   ;;  %s2119_s28 = sphi %s2184_s28, %s23_s28   ;;  %s2115_s27 = sphi %s2182_s27, %s2749_s27   ;;  %s2111_s26 = sphi %s2180_s26, %s2748_s26   ;;  %s2107_s25 = sphi %s2178_s25, %s2747_s25   ;;  %s2103_s24 = sphi %s2176_s24, %s2746_s24   ;;  %s2099_s23 = sphi %s2174_s23, %s2745_s23   ;;  %s2095_s22 = sphi %s2172_s22, %s2744_s22   ;;  %s2091_s21 = sphi %s2170_s21, %s2743_s21   ;;  %s2087_s20 = sphi %s2168_s20, %s2742_s20   ;;  %s2083_s19 = sphi %s2166_s19, %s2741_s19   ;;  %s2079_s18 = sphi %s2164_s18, %s2740_s18   ;;  %s2075_s17 = sphi %s2162_s17, %s2739_s17   ;;  %s2071_s16 = sphi %s2160_s16, %s2738_s16   ;;  %s2067_s15 = sphi %s2158_s15, %s2735_s15  }
  0x11   : > { %2690 = sst [smem:[#allocation15_spill]] %s2071_s16  ;;  %s1355_s30 = sadd.s32 4294967294, %s2119_s28  }
  0x12   : > { %2691 = sst [smem:[#allocation16_spill]] %s2103_s24  ;;  %p57_p0 = scmp.ne.s32.totalorder %s2095_s22, %s2091_s21 }
  0x13   : > { %2692 = sst [smem:[#allocation17_spill]] %s2107_s25  ;;  %p2666_p1 = scmp.eq.s32.totalorder %s2225_s29, 0 }
  0x14   : > { %2693 = sst [smem:[#allocation18_spill]] %s2225_s29  ;;  %p83_p2 = scmp.ne.s32.totalorder %s2083_s19, %s2079_s18 }
  0x15   : > { %p2234_p3 = por %p2666_p1, %p57_p0  ;;  %p148_p4 = scmp.ne.s32.totalorder %s2075_s17, %s2071_s16 }
  0x16   : > { %p2242_p5 = por %p83_p2, %p2666_p1  ;;  %p149_p6 = scmp.eq.s32.totalorder %s2225_s29, 3 }
  0x17   : > { %s2694_s6 = scalar_select %p2234_p3, 1, 0 }
  0x18   : > { %s2695_s7 = scalar_select %p2242_p5, 1, 0 }
  0x19   : > { %p154_p7 = scmp.ne.s32.totalorder %s2071_s16, %s2067_s15  ;;  %p155_p8 = scmp.eq.s32.totalorder %s1355_s30, 3 }
  0x1a   : > { %2696 = sst [smem:[#allocation19_spill]] %s2695_s7  ;;  %p2249_p9 = por %p149_p6, %p148_p4 }
  0x1b   : > { %p1356_p10 = scmp.ge.s32.totalorder %s2119_s28, 1  ;;  %p2254_p11 = por %p155_p8, %p154_p7 }
  0x1c   : > { %s2697_s8 = scalar_select %p2249_p9, 1, 0 }
  0x1d   : > { %s2699_s9 = scalar_select %p2254_p11, 1, 0 }
  0x1e   : > { %2698 = sst [smem:[#allocation20_spill]] %s2697_s8  ;;  %p162_p12 = scmp.lt.s32.totalorder %s2119_s28, 5 }
  0x1f   : > { %2700 = sst [smem:[#allocation21_spill]] %s2699_s9  ;;  %s2121_s11 = smov [#allocation8]  }
  0x20   : > { %p2259_p13 = pnand %p1356_p10, %p162_p12  ;;  %s174_s12 = sshll.u32 %s2121_s11, 4  ;;  %s175_s12 = int_to_ptr.vmem [resolvable:$true] %s174_s12 }
  0x21   : > { %s2703_s2 = sld [smem:[#allocation24_spill]] }
  0x22   : > { %s2701_s10 = scalar_select %p2259_p13, 1, 0 }
  0x23   : > { %p1665_p0 = pneg %p2259_p13 }
  0x25   : > { %p2267_p2 = pnand %p1665_p0, %p2666_p1 }
  0x27   : > { %s1877_s21 = scalar_lea.hbm %s2703_s2, 1024  ;;  %p1879_p6 = pneg %p2267_p2 }
  0x28   : > { %p1878_p4 = scmp.ne.s32.totalorder %s2703_s2, %s1877_s21  ;;  %p1884_p10 = scmp.lt.u32.totalorder %s1877_s21, %s2703_s2 }
  0x2a   : > { %p1880_p7 = pnand %p1879_p6, %p1878_p4 }
  0x2c   : > { %p1881_p8 = pneg %p1880_p7 }
  0x2e   : > { %p1886_p12 = pnand %p1884_p10, %p1881_p8 }
  0x30   : > { %1889 = shalt.err (!%p1886_p12)
}
  0x31   : > { %s1890_s15 = scalar_lea.vmem %s175_s12, 1024  ;;  %p1898_p9 = scmp.lt.s32.totalorder %s175_s12, %s175_s12 }
  0x32   : > { %p1891_p0 = scmp.ne.s32.totalorder %s175_s12, %s1890_s15  ;;  %p1899_p5 = scmp.lt.s32.totalorder %s1890_s15, %s1890_s15 }
  0x34   : > { %p1893_p1 = pnand %p1891_p0, %p1879_p6  ;;  %p1900_p3 = por %p1899_p5, %p1898_p9 }
  0x36   : > { %p1894_p11 = pneg %p1893_p1 }
  0x38   : > { %p1901_p13 = pnand %p1900_p3, %p1894_p11 }
  0x3a   : > { %1904 = shalt.err (!%p1901_p13)
}
  0x3b   : > { %s2671_s5 = smov 64   ;;  %s2672_s9 = smov 4  }
  0x3c   : > { %1668 = dma.hbm_to_vmem [thread:$0]  (!%p2267_p2), %s2703_s2, 1024, %s175_s12, [#allocation7], %s2671_s5, %s2671_s5, %s2672_s9  }
  0x3d   : > { %s32_s18 = sadd.s32 1, %s2111_s26  ;;  %s35_s21 = sadd.s32 1, %s2115_s27 }
  0x3e   : > { %p33_p1 = scmp.ge.s32.totalorder %s32_s18, 2  ;;  %s44_s30 = sadd.s32 1, %s2099_s23 }
  0x3f   : > { %p51_p3 = scmp.ne.s32.totalorder %s2099_s23, %s2095_s22  ;;  %p2685_p5 = scmp.eq.s32.totalorder %s2119_s28, 0 }
  0x40   : > { %s2751_s18 = smov (%p33_p1, %s32_s18), 0  ;;  %s2753_s21 = smov (!%p33_p1, %s35_s21), %s2115_s27 }
  0x41   : > { %2704 = sst [smem:[#allocation22_spill]] %s2751_s18  ;;  %s2300_s13 = ssub.s32 %s2111_s26, %s2751_s18 }
  0x42   : > { %p37_p9 = scmp.ge.s32.totalorder %s2753_s21, 2  ;;  %p68_p11 = scmp.eq.s32.totalorder %s2300_s13, 0 }
  0x43   : > { %p2306_p13 = por %p2685_p5, %p51_p3  ;;  %p2684_p2 = scmp.lt.s32.totalorder %s2119_s28, 4 }
  0x44   : > { %s2755_s21 = smov (%p37_p9, %s2753_s21), 0  ;;  %s191_s11 = sand.u32 1, %s2099_s23  }
  0x45   : > { %2706 = sst [smem:[#allocation23_spill]] %s2755_s21  ;;  %s1361_s15 = sshll.u32 %s2111_s26, 1 }
  0x46   : > { %s39_s14 = ssub.s32 %s2115_s27, %s2755_s21  ;;  %s1359_s9 = sshll.u32 %s191_s11, 8 }
  0x47   : > { %s41_s5 = sor.u32 %s2300_s13, %s39_s14  ;;  %p136_p4 = scmp.eq.s32.totalorder %s39_s14, 0 }
  0x48   : > { %p42_p6 = scmp.eq.s32.totalorder %s41_s5, 0  ;;  %s2707_s2 = sadd.s32 1, %s2075_s17 }
  0x49   : > { %s2321_s18 = scalar_select %p136_p4, %s2075_s17, %s2707_s2  }
  0x4a   : > { %s2324_s4 = scalar_select %p42_p6, %s2099_s23, %s44_s30  }
  0x4b   : > { %s1436_s8 = sshll.u32 %s2115_s27, 7  ;;  %s195_s3 = scalar_lea.vmem [#allocation3], %s1359_s9 }
  0x4c   : > { %s202_s25 = sadd.s32 %s1436_s8, %s1361_s15  ;;  %s205_s24 = sshll.u32 %s195_s3, 4  ;;  %s2327_s24 = int_to_ptr.vmem [resolvable:$true] %s205_s24 }
  0x4d   : > { %s1363_s16 = sshll.u32 %s202_s25, 6  ;;  %p2338_p7 = pnand %p2684_p2, %p2306_p13 }
  0x4e   : > { %s2332_s21 = scalar_lea.hbm %s2659_s0, %s1363_s16  ;;  %s2342_s3 = scalar_lea.sflag [#allocation4], %s191_s11 }
  0x4f   : > { %s1905_s25 = scalar_lea.hbm %s2332_s21, 4096  ;;  %p1907_p10 = pneg %p2338_p7 }
  0x50   : > { %p1906_p8 = scmp.ne.s32.totalorder %s2332_s21, %s1905_s25  ;;  %s1910_s7 = scalar_lea.hbm %s2659_s0, 16384 }
  0x51   : > { %p1911_p1 = scmp.lt.u32.totalorder %s2332_s21, %s2659_s0  ;;  %p1912_p3 = scmp.lt.u32.totalorder %s1910_s7, %s1905_s25 }
  0x52   : > { %p1908_p12 = pnand %p1907_p10, %p1906_p8  ;;  %p1914_p13 = scmp.lt.u32.totalorder %s1905_s25, %s2332_s21 }
  0x53   : > { %p1913_p9 = por %p1912_p3, %p1911_p1 }
  0x54   : > { %p1909_p0 = pneg %p1908_p12 }
  0x55   : > { %p1915_p4 = por %p1914_p13, %p1913_p9 }
  0x57   : > { %p1916_p6 = pnand %p1915_p4, %p1909_p0 }
  0x59   : > { %1919 = shalt.err (!%p1916_p6)
}
  0x5a   : > { %s1920_s9 = scalar_lea.vmem %s2327_s24, 4096  ;;  %s2124_s30 = smov [#allocation3]  }
  0x5b   : > { %p1921_p8 = scmp.ne.s32.totalorder %s2327_s24, %s1920_s9  ;;  %s1925_s12 = sshll.u32 %s2124_s30, 4  ;;  %s1926_s12 = int_to_ptr.vmem [resolvable:$false] %s1925_s12 }
  0x5c   : > { %s1927_s11 = scalar_lea.vmem %s1926_s12, 8192  ;;  %p1928_p5 = scmp.lt.s32.totalorder %s2327_s24, %s1926_s12 }
  0x5d   : > { %p1923_p12 = pnand %p1921_p8, %p1907_p10  ;;  %p1929_p1 = scmp.lt.s32.totalorder %s1927_s11, %s1920_s9 }
  0x5f   : > { %p1924_p2 = pneg %p1923_p12  ;;  %p1930_p3 = por %p1929_p1, %p1928_p5 }
  0x61   : > { %p1931_p9 = pnand %p1930_p3, %p1924_p2 }
  0x63   : > { %1934 = shalt.err (!%p1931_p9)
}
  0x64   : > { %s2125_s15 = smov 256   ;;  %s2126_s14 = smov 128  }
  0x65   : > { %s2127_s25 = smov 8   ;;  %s215_s16 = sand.u32 1, %s2119_s28  }
  0x66   : > { %1672 = dma.hbm_to_vmem [thread:$0]  (!%p2338_p7), %s2332_s21, 4096, %s2327_s24, %s2342_s3, %s2125_s15, %s2126_s14, %s2127_s25  }
  0x67   : > { %s70_s29 = sadd.s32 1, %s2087_s20  ;;  %p77_p5 = scmp.ne.s32.totalorder %s2087_s20, %s2083_s19 }
  0x68   : > { %s2377_s7 = scalar_select %p68_p11, %s2087_s20, %s70_s29  }
  0x69   : > { %p2709_p2 = scmp.eq.s32.totalorder %s2119_s28, 0  ;;  %s217_s8 = sand.u32 1, %s2087_s20  }
  0x6a   : > { %s1364_s5 = sshll.u32 %s217_s8, 7  ;;  %s1437_s9 = sshll.u32 %s2111_s26, 11 }
  0x6b   : > { %p79_p10 = por %p77_p5, %p2709_p2  ;;  %s2386_s11 = scalar_lea.hbm %s2660_s1, %s1437_s9 }
  0x6c   : > { %s219_s24 = scalar_lea.vmem [#allocation6], %s1364_s5  ;;  %p2710_p7 = scmp.lt.s32.totalorder %s2119_s28, 4 }
  0x6d   : > { %s226_s21 = sshll.u32 %s219_s24, 4  ;;  %s2396_s2 = scalar_lea.sflag [#allocation7], %s215_s16  ;;  %s2394_s21 = int_to_ptr.vmem [resolvable:$true] %s226_s21 }
  0x6e   : > { %p2390_p0 = pnand %p2710_p7, %p79_p10  ;;  %s1935_s3 = scalar_lea.hbm %s2386_s11, 2048 }
  0x6f   : > { %p1936_p11 = scmp.ne.s32.totalorder %s2386_s11, %s1935_s3  ;;  %s1940_s25 = scalar_lea.hbm %s2660_s1, 4096 }
  0x70   : > { %p1937_p13 = pneg %p2390_p0  ;;  %p1941_p8 = scmp.lt.u32.totalorder %s2386_s11, %s2660_s1 }
  0x71   : > { %p1942_p12 = scmp.lt.u32.totalorder %s1940_s25, %s1935_s3  ;;  %p1944_p3 = scmp.lt.u32.totalorder %s1935_s3, %s2386_s11 }
  0x72   : > { %p1938_p4 = pnand %p1937_p13, %p1936_p11 }
  0x73   : > { %p1943_p1 = por %p1942_p12, %p1941_p8 }
  0x74   : > { %p1939_p6 = pneg %p1938_p4 }
  0x75   : > { %p1945_p9 = por %p1944_p3, %p1943_p1 }
  0x77   : > { %p1946_p5 = pnand %p1945_p9, %p1939_p6 }
  0x79   : > { %1949 = shalt.err (!%p1946_p5)
}
  0x7a   : > { %s1950_s16 = scalar_lea.vmem %s2394_s21, 2048  ;;  %s2128_s5 = smov [#allocation6]  }
  0x7b   : > { %p1951_p2 = scmp.ne.s32.totalorder %s2394_s21, %s1950_s16  ;;  %s1955_s9 = sshll.u32 %s2128_s5, 4  ;;  %s1956_s9 = int_to_ptr.vmem [resolvable:$false] %s1955_s9 }
  0x7c   : > { %s1957_s30 = scalar_lea.vmem %s1956_s9, 4096  ;;  %p1958_p11 = scmp.lt.s32.totalorder %s2394_s21, %s1956_s9 }
  0x7d   : > { %p1953_p10 = pnand %p1951_p2, %p1937_p13  ;;  %p1959_p4 = scmp.lt.s32.totalorder %s1957_s30, %s1950_s16 }
  0x7f   : > { %p1954_p7 = pneg %p1953_p10  ;;  %p1960_p8 = por %p1959_p4, %p1958_p11 }
  0x81   : > { %p1961_p12 = pnand %p1960_p8, %p1954_p7 }
  0x83   : > { %1964 = shalt.err (!%p1961_p12)
}
  0x84   : > { %s2712_s12 = smov 4   ;;  %s2713_s24 = smov 64  }
  0x85   : > { %1675 = dma.hbm_to_vmem [thread:$0]  (!%p2390_p0), %s2386_s11, 2048, %s2394_s21, %s2396_s2, %s2713_s24, %s2713_s24, %s2712_s12  }
  0x86   : > { %p2714_p13 = scmp.ne.s32.totalorder %s2701_s10, 0 }
  0x87   : > { %s240_s3 = sand.u32 (!%p2714_p13), 1, %s2095_s22   ;;  %p2715_p6 = scmp.ne.s32.totalorder (!%p2714_p13), %s2694_s6, 0 }
  0x88   : > { %238 = sbr.rel (%p2714_p13) target bundleno = 766 (0x2fe), region = 36  ;;  %s1368_s15 = sshll.u32 (!%p2714_p13), %s240_s3, 8 }
  0x89   : > { %s241_s14 = scalar_lea.sflag (!%p2714_p13), [#allocation4], %s240_s3  ;;  %s2430_s25 = scalar_lea.vmem (!%p2714_p13), [#allocation3], %s1368_s15 }
  0x8f   : > { %2050 = dma.done.wait (%p2715_p6), %s241_s14, 4096  }
  0x90   : > { %2052 = vsyncadd (%p2715_p6), %s241_s14, 4294963200  ;;  %s2716_s13 = sld [smem:[#allocation18_spill]]  ;;  %s2717_s29 = sld [smem:[#allocation19_spill]] }
  0x91   : > { %s251_s11 = sand.u32 1, %s2083_s19  }
  0x92   : > { %s1369_s21 = sshll.u32 %s251_s11, 7 }
  0x93   : > { %s2438_s2 = scalar_lea.vmem [#allocation6], %s1369_s21 }
  0x96   : > { %s249_s8 = sand.u32 1, %s2716_s13   ;;  %p2718_p0 = scmp.ne.s32.totalorder %s2717_s29, 0 }
  0x97   : > { %s250_s10 = scalar_lea.sflag [#allocation7], %s249_s8 }
  0x98   : > { %2054 = dma.done.wait (%p2718_p0), %s250_s10, 2048  }
  0x99   : > { %2056 = vsyncadd (%p2718_p0), %s250_s10, 4294965248  ;;  %p2719_p1 = scmp.eq.s32.totalorder %s2716_s13, 0 }
  0x9b   : > { %2058 = dma.done.wait (%p2719_p1), [#allocation7], 1024   ;;  %p2720_p3 = pmov %p2719_p1 }
  0x9c   : > { %s2721_s6 = sld [smem:[#allocation15_spill]]  ;;  %s2722_s30 = sld [smem:[#allocation16_spill]] }
  0x9d   : > { %2060 = vsyncadd (%p2720_p3), [#allocation7], 4294966272 }
  0xa2   : > { %s284_s16 = sand.u32 1, %s2721_s6   ;;  %p1372_p9 = scmp.ne.s32.totalorder %s2722_s30, 0 }
  0xa3   : > { %s1371_s5 = sshll.u32 %s284_s16, 8  ;;  %v2129_v0 = vmov (!%p1372_p9), 0.0  }
  0xa4   : > { %s2451_s9 = scalar_lea.vmem [#allocation9], %s1371_s5  ;;  %295 = sbr.rel (%p1372_p9) target bundleno = 180 (0xb4), region = 52  ;;  %296 = vst [vmem:[#allocation2] sm:$0xff] (!%p1372_p9), %v2129_v0  ;;  %297 = vst [vmem:[#allocation2 + $0x8] sm:$0xff] (!%p1372_p9), %v2129_v0 }
  0xa5   : > { %298 = vst [vmem:[#allocation2 + $0x10] sm:$0xff] (!%p1372_p9), %v2129_v0  ;;  %299 = vst [vmem:[#allocation2 + $0x18] sm:$0xff] (!%p1372_p9), %v2129_v0 }
  0xa6   : > { %300 = vst [vmem:[#allocation2 + $0x20] sm:$0xff] (!%p1372_p9), %v2129_v0  ;;  %301 = vst [vmem:[#allocation2 + $0x28] sm:$0xff] (!%p1372_p9), %v2129_v0 }
  0xa7   : > { %302 = vst [vmem:[#allocation2 + $0x30] sm:$0xff] (!%p1372_p9), %v2129_v0  ;;  %303 = vst [vmem:[#allocation2 + $0x38] sm:$0xff] (!%p1372_p9), %v2129_v0 }
  0xa8   : > { %304 = vst [vmem:[#allocation2 + $0x40] sm:$0xff] (!%p1372_p9), %v2129_v0  ;;  %305 = vst [vmem:[#allocation2 + $0x48] sm:$0xff] (!%p1372_p9), %v2129_v0 }
  0xa9   : > { %306 = vst [vmem:[#allocation2 + $0x50] sm:$0xff] (!%p1372_p9), %v2129_v0  ;;  %307 = vst [vmem:[#allocation2 + $0x58] sm:$0xff] (!%p1372_p9), %v2129_v0 }
  0xaa   : > { %308 = vst [vmem:[#allocation2 + $0x60] sm:$0xff] (!%p1372_p9), %v2129_v0  ;;  %309 = vst [vmem:[#allocation2 + $0x68] sm:$0xff] (!%p1372_p9), %v2129_v0 }
  0xab   : > { %310 = vst [vmem:[#allocation2 + $0x70] sm:$0xff] %v2129_v0  ;;  %311 = vst [vmem:[#allocation2 + $0x78] sm:$0xff] %v2129_v0 }
  0xac   : > { %312 = vst [vmem:[#allocation2 + $0x80] sm:$0xff] %v2129_v0  ;;  %313 = vst [vmem:[#allocation2 + $0x88] sm:$0xff] %v2129_v0 }
  0xad   : > { %314 = vst [vmem:[#allocation2 + $0x90] sm:$0xff] %v2129_v0  ;;  %315 = vst [vmem:[#allocation2 + $0x98] sm:$0xff] %v2129_v0 }
  0xae   : > { %316 = vst [vmem:[#allocation2 + $0xa0] sm:$0xff] %v2129_v0  ;;  %317 = vst [vmem:[#allocation2 + $0xa8] sm:$0xff] %v2129_v0 }
  0xaf   : > { %318 = vst [vmem:[#allocation2 + $0xb0] sm:$0xff] %v2129_v0  ;;  %319 = vst [vmem:[#allocation2 + $0xb8] sm:$0xff] %v2129_v0 }
  0xb0   : > { %320 = vst [vmem:[#allocation2 + $0xc0] sm:$0xff] %v2129_v0  ;;  %321 = vst [vmem:[#allocation2 + $0xc8] sm:$0xff] %v2129_v0 }
  0xb1   : > { %322 = vst [vmem:[#allocation2 + $0xd0] sm:$0xff] %v2129_v0  ;;  %323 = vst [vmem:[#allocation2 + $0xd8] sm:$0xff] %v2129_v0 }
  0xb2   : > { %324 = vst [vmem:[#allocation2 + $0xe0] sm:$0xff] %v2129_v0  ;;  %325 = vst [vmem:[#allocation2 + $0xe8] sm:$0xff] %v2129_v0 }
  0xb3   : > { %326 = vst [vmem:[#allocation2 + $0xf0] sm:$0xff] %v2129_v0  ;;  %327 = vst [vmem:[#allocation2 + $0xf8] sm:$0xff] %v2129_v0 }
  0xb4 PF: > { %v1805_v1 = vld [vmem:[%s2438_s2 + $0x40] sm:$0xff]   ;;  %v1807_v3 = vld [vmem:[%s2438_s2 + $0x48] sm:$0xff]   ;;  %v1809_v5 = vld [vmem:[%s2438_s2 + $0x50] sm:$0xff]   ;;  %s2723_s12 = sld [smem:[#allocation16_spill]] }
  0xb5   : > { %v1806_v2 = vld [vmem:[%s2438_s2] sm:$0xff]   ;;  %1439 = vmatprep.subr.bf16.mxu0 %v1805_v1  ;;  %1623 = vmatprep.subr.bf16.mxu1 %v1805_v1  ;;  %v1808_v4 = vld [vmem:[%s2438_s2 + $0x8] sm:$0xff]   ;;  %v1810_v6 = vld [vmem:[%s2438_s2 + $0x10] sm:$0xff]  }
  0xb6   : > { %1440 = vmatpush3.bf16.msra.mxu0 %v1806_v2  ;;  %1631 = vmatpush3.bf16.msra.mxu1 %v1806_v2  ;;  %v1811_v7 = vld [vmem:[%s2438_s2 + $0x58] sm:$0xff]   ;;  %v1813_v9 = vld [vmem:[%s2438_s2 + $0x60] sm:$0xff]   ;;  %v1815_v11 = vld [vmem:[%s2438_s2 + $0x68] sm:$0xff]  }
  0xb7   : > { %1441 = vmatprep.subr.bf16.mxu0 %v1807_v3  ;;  %1624 = vmatprep.subr.bf16.mxu1 %v1807_v3  ;;  %v1812_v8 = vld [vmem:[%s2438_s2 + $0x18] sm:$0xff]   ;;  %v1814_v10 = vld [vmem:[%s2438_s2 + $0x20] sm:$0xff]   ;;  %v1816_v14 = vld [vmem:[%s2438_s2 + $0x28] sm:$0xff]  }
  0xb8   : > { %v1823_v12 = vld [vmem:[%s2430_s25 + $0x4] ss:$8 sps:$4 sm:$0xff]   ;;  %v1817_v15 = vld [vmem:[%s2438_s2 + $0x70] sm:$0xff]   ;;  %v1819_v17 = vld [vmem:[%s2438_s2 + $0x78] sm:$0xff]  }
  0xb9   : > { %v1826_v13 = vld [vmem:[%s2430_s25 + $0x84] ss:$8 sps:$4 sm:$0xff]   ;;  %712 = vmatprep.mubr.bf16.mxu0 %v1823_v12  ;;  %v1818_v16 = vld [vmem:[%s2438_s2 + $0x30] sm:$0xff]   ;;  %v1820_v18 = vld [vmem:[%s2438_s2 + $0x38] sm:$0xff]  }
  0xba   : > { %1442 = vmatpush3.bf16.msra.mxu0 %v1808_v4  ;;  %1632 = vmatpush3.bf16.msra.mxu1 %v1808_v4  ;;  %v1821_v19 = vld [vmem:[%s2430_s25] ss:$8 sps:$4 sm:$0xff]   ;;  %v1827_v21 = vld [vmem:[%s2430_s25 + $0x14] ss:$8 sps:$4 sm:$0xff]   ;;  %v1831_v23 = vld [vmem:[%s2430_s25 + $0x10] ss:$8 sps:$4 sm:$0xff]  }
  0xbb   : > { %1443 = vmatprep.subr.bf16.mxu0 %v1809_v5  ;;  %1625 = vmatprep.subr.bf16.mxu1 %v1809_v5  ;;  %v1824_v20 = vld [vmem:[%s2430_s25 + $0x80] ss:$8 sps:$4 sm:$0xff]   ;;  %v1829_v22 = vld [vmem:[%s2430_s25 + $0x94] ss:$8 sps:$4 sm:$0xff]   ;;  %v1832_v24 = vld [vmem:[%s2430_s25 + $0x90] ss:$8 sps:$4 sm:$0xff]  }
  0xbc   : > { %776 = vmatprep.mubr.bf16.mxu1 %v1826_v13  ;;  %v1833_v25 = vld [vmem:[%s2430_s25 + $0x24] ss:$8 sps:$4 sm:$0xff]   ;;  %v1837_v27 = vld [vmem:[%s2430_s25 + $0x20] ss:$8 sps:$4 sm:$0xff]   ;;  %v1839_v29 = vld [vmem:[%s2430_s25 + $0x34] ss:$8 sps:$4 sm:$0xff]  }
  0xbd   : > { %v1835_v26 = vld [vmem:[%s2430_s25 + $0xa4] ss:$8 sps:$4 sm:$0xff]   ;;  %v1838_v28 = vld [vmem:[%s2430_s25 + $0xa0] ss:$8 sps:$4 sm:$0xff]   ;;  %v1841_v30 = vld [vmem:[%s2430_s25 + $0xb4] ss:$8 sps:$4 sm:$0xff]  }
  0xbe   : > { %1444 = vmatpush3.bf16.msra.mxu0 %v1810_v6  ;;  %1633 = vmatpush3.bf16.msra.mxu1 %v1810_v6  ;;  %v1843_v31 = vld [vmem:[%s2430_s25 + $0x30] ss:$8 sps:$4 sm:$0xff]   ;;  %v1845_v33 = vld [vmem:[%s2430_s25 + $0x44] ss:$8 sps:$4 sm:$0xff]   ;;  %v1849_v35 = vld [vmem:[%s2430_s25 + $0x40] ss:$8 sps:$4 sm:$0xff]  }
  0xbf   : > { %1445 = vmatprep.subr.bf16.mxu0 %v1811_v7  ;;  %1626 = vmatprep.subr.bf16.mxu1 %v1811_v7  ;;  %v1844_v32 = vld [vmem:[%s2430_s25 + $0xb0] ss:$8 sps:$4 sm:$0xff]   ;;  %v1847_v34 = vld [vmem:[%s2430_s25 + $0xc4] ss:$8 sps:$4 sm:$0xff]   ;;  %v1850_v36 = vld [vmem:[%s2430_s25 + $0xc0] ss:$8 sps:$4 sm:$0xff]  }
  0xc0   : > { %v1851_v37 = vld [vmem:[%s2430_s25 + $0x54] ss:$8 sps:$4 sm:$0xff]   ;;  %v1855_v39 = vld [vmem:[%s2430_s25 + $0x50] ss:$8 sps:$4 sm:$0xff]   ;;  %v1857_v41 = vld [vmem:[%s2430_s25 + $0x64] ss:$8 sps:$4 sm:$0xff]  }
  0xc1   : > { %v1853_v38 = vld [vmem:[%s2430_s25 + $0xd4] ss:$8 sps:$4 sm:$0xff]   ;;  %v1856_v40 = vld [vmem:[%s2430_s25 + $0xd0] ss:$8 sps:$4 sm:$0xff]   ;;  %v1859_v42 = vld [vmem:[%s2430_s25 + $0xe4] ss:$8 sps:$4 sm:$0xff]  }
  0xc2   : > { %1446 = vmatpush3.bf16.msra.mxu0 %v1812_v8  ;;  %1634 = vmatpush3.bf16.msra.mxu1 %v1812_v8  ;;  %v1861_v43 = vld [vmem:[%s2430_s25 + $0x60] ss:$8 sps:$4 sm:$0xff]   ;;  %v1863_v45 = vld [vmem:[%s2430_s25 + $0x74] ss:$8 sps:$4 sm:$0xff]   ;;  %v1867_v47 = vld [vmem:[%s2430_s25 + $0x70] ss:$8 sps:$4 sm:$0xff]  }
  0xc3   : > { %1447 = vmatprep.subr.bf16.mxu0 %v1813_v9  ;;  %1627 = vmatprep.subr.bf16.mxu1 %v1813_v9  ;;  %v1862_v44 = vld [vmem:[%s2430_s25 + $0xe0] ss:$8 sps:$4 sm:$0xff]   ;;  %v1865_v46 = vld [vmem:[%s2430_s25 + $0xf4] ss:$8 sps:$4 sm:$0xff]   ;;  %v1868_v48 = vld [vmem:[%s2430_s25 + $0xf0] ss:$8 sps:$4 sm:$0xff]  }
  0xc4   : > { %v328_v51 = vld [vmem:[#allocation2] sm:$0xff]  ;;  %v329_v59 = vld [vmem:[#allocation2 + $0x8] sm:$0xff]  ;;  %v330_v7 = vld [vmem:[#allocation2 + $0x10] sm:$0xff]  ;;  %p1421_p5 = scmp.ne.s32.totalorder %s2723_s12, 1 }
  0xc5   : > { %v344_v53 = vld [vmem:[#allocation2 + $0x80] sm:$0xff]  ;;  %v345_v61 = vld [vmem:[#allocation2 + $0x88] sm:$0xff]  ;;  %v346_v9 = vld [vmem:[#allocation2 + $0x90] sm:$0xff]  ;;  %s2724_s15 = sld [smem:[#allocation25_spill]] (!%p1421_p5) }
  0xc6   : > { %1448 = vmatpush3.bf16.msra.mxu0 %v1814_v10  ;;  %1635 = vmatpush3.bf16.msra.mxu1 %v1814_v10 }
  0xc7   : > { %1449 = vmatprep.subr.bf16.mxu0 %v1815_v11  ;;  %1628 = vmatprep.subr.bf16.mxu1 %v1815_v11 }
  0xca   : > { %1450 = vmatpush3.bf16.msra.mxu0 %v1816_v14  ;;  %1636 = vmatpush3.bf16.msra.mxu1 %v1816_v14 }
  0xcb   : > { %1451 = vmatprep.subr.bf16.mxu0 %v1817_v15  ;;  %1629 = vmatprep.subr.bf16.mxu1 %v1817_v15  ;;  %v331_v15 = vld [vmem:[#allocation2 + $0x18] sm:$0xff] }
  0xce   : > { %1452 = vmatpush3.bf16.msra.mxu0 %v1818_v16  ;;  %1637 = vmatpush3.bf16.msra.mxu1 %v1818_v16 }
  0xcf   : > { %1453 = vmatprep.subr.bf16.mxu0 %v1819_v17  ;;  %1630 = vmatprep.subr.bf16.mxu1 %v1819_v17  ;;  %v347_v17 = vld [vmem:[#allocation2 + $0x98] sm:$0xff] }
  0xd2   : > { %1454 = vmatpush3.bf16.msra.mxu0 %v1820_v18  ;;  %1638 = vmatpush3.bf16.msra.mxu1 %v1820_v18 }
  0xd5   : > { %713 = vmatmul.mubr.bf16.vlgmr.msra.gmra.mrb[0].mxu0 %v1821_v19  ;;  %777 = vmatmul.mubr.bf16.vlgmr.msra.gmra.mrb[0].mxu1 %v1824_v20 }
  0xd6   : > { %720 = vmatprep.mubr.bf16.mxu0 %v1827_v21  ;;  %784 = vmatprep.mubr.bf16.mxu1 %v1829_v22 }
  0xdd   : > { %721 = vmatmul.mubr.bf16.gmra.mrb[4].mxu0 %v1831_v23  ;;  %785 = vmatmul.mubr.bf16.gmra.mrb[4].mxu1 %v1832_v24 }
  0xde   : > { %728 = vmatprep.mubr.bf16.mxu0 %v1833_v25  ;;  %792 = vmatprep.mubr.bf16.mxu1 %v1835_v26 }
  0xe5   : > { %729 = vmatmul.mubr.bf16.gmra.mrb[8].mxu0 %v1837_v27  ;;  %793 = vmatmul.mubr.bf16.gmra.mrb[8].mxu1 %v1838_v28  ;;  %v332_v27 = vld [vmem:[#allocation2 + $0x20] sm:$0xff] }
  0xe6   : > { %736 = vmatprep.mubr.bf16.mxu0 %v1839_v29  ;;  %800 = vmatprep.mubr.bf16.mxu1 %v1841_v30  ;;  %v348_v29 = vld [vmem:[#allocation2 + $0xa0] sm:$0xff] }
  0xed   : > { %737 = vmatmul.mubr.bf16.gmra.mrb[12].mxu0 %v1843_v31  ;;  %801 = vmatmul.mubr.bf16.gmra.mrb[12].mxu1 %v1844_v32 }
  0xee   : > { %744 = vmatprep.mubr.bf16.mxu0 %v1845_v33  ;;  %808 = vmatprep.mubr.bf16.mxu1 %v1847_v34 }
  0xf5   : > { %745 = vmatmul.mubr.bf16.gmra.mrb[16].mxu0 %v1849_v35  ;;  %809 = vmatmul.mubr.bf16.gmra.mrb[16].mxu1 %v1850_v36  ;;  %v333_v35 = vld [vmem:[#allocation2 + $0x28] sm:$0xff] }
  0xf6   : > { %752 = vmatprep.mubr.bf16.mxu0 %v1851_v37  ;;  %816 = vmatprep.mubr.bf16.mxu1 %v1853_v38  ;;  %v349_v37 = vld [vmem:[#allocation2 + $0xa8] sm:$0xff] }
  0xfd   : > { %753 = vmatmul.mubr.bf16.gmra.mrb[20].mxu0 %v1855_v39  ;;  %817 = vmatmul.mubr.bf16.gmra.mrb[20].mxu1 %v1856_v40 }
  0xfe   : > { %760 = vmatprep.mubr.bf16.mxu0 %v1857_v41  ;;  %824 = vmatprep.mubr.bf16.mxu1 %v1859_v42 }
 0x105   : > { %761 = vmatmul.mubr.bf16.gmra.mrb[24].mxu0 %v1861_v43  ;;  %825 = vmatmul.mubr.bf16.gmra.mrb[24].mxu1 %v1862_v44 }
 0x106   : > { %768 = vmatprep.mubr.bf16.mxu0 %v1863_v45  ;;  %832 = vmatprep.mubr.bf16.mxu1 %v1865_v46 }
 0x10d   : > { %769 = vmatmul.mubr.bf16.gmra.mrb[28].mxu0 %v1867_v47  ;;  %833 = vmatmul.mubr.bf16.gmra.mrb[28].mxu1 %v1868_v48  ;;  %v334_v47 = vld [vmem:[#allocation2 + $0x30] sm:$0xff] }
 0x1a8   : > { %v1455_v49 = vpop.f32.mrb[0].mxu0  ;;  %v1503_v50 = vpop.f32.mrb[0].mxu1 }
 0x1a9   : > { %v1456_v52 = vpop.f32.mrb[1].mxu0  ;;  %v1504_v54 = vpop.f32.mrb[1].mxu1 }
 0x1aa   : > { %v1457_v55 = vadd.f32 %v1456_v52, %v1455_v49  ;;  %v1505_v56 = vadd.f32 %v1504_v54, %v1503_v50  ;;  %v1458_v57 = vpop.f32.mrb[2].mxu0  ;;  %v1506_v58 = vpop.f32.mrb[2].mxu1  ;;  %v350_v49 = vld [vmem:[#allocation2 + $0xb0] sm:$0xff] }
 0x1ab   : > { %v1459_v60 = vpop.f32.mrb[3].mxu0  ;;  %v1507_v62 = vpop.f32.mrb[3].mxu1 }
 0x1ac   : > { %v841_v63 = vadd.f32 %v1457_v55, %v328_v51  ;;  %v857_v0 = vadd.f32 %v1505_v56, %v344_v53  ;;  %v1460_v1 = vadd.f32 %v1459_v60, %v1458_v57  ;;  %v1508_v2 = vadd.f32 %v1507_v62, %v1506_v58  ;;  %v335_v55 = vld [vmem:[#allocation2 + $0x38] sm:$0xff] }
 0x1ad   : > { %v351_v57 = vld [vmem:[#allocation2 + $0xb8] sm:$0xff] }
 0x1ae   : > { %873 = vst [vmem:[#allocation2] sm:$0xff] %v841_v63  ;;  %889 = vst [vmem:[#allocation2 + $0x80] sm:$0xff] %v857_v0  ;;  %v842_v3 = vadd.f32 %v1460_v1, %v329_v59  ;;  %v858_v4 = vadd.f32 %v1508_v2, %v345_v61 }
 0x1b0   : > { %874 = vst [vmem:[#allocation2 + $0x8] sm:$0xff] %v842_v3  ;;  %890 = vst [vmem:[#allocation2 + $0x88] sm:$0xff] %v858_v4  ;;  %v1461_v5 = vpop.f32.mrb[4].mxu0  ;;  %v1509_v6 = vpop.f32.mrb[4].mxu1  ;;  %v336_v3 = vld [vmem:[#allocation2 + $0x40] sm:$0xff] }
 0x1b1   : > { %v1462_v8 = vpop.f32.mrb[5].mxu0  ;;  %v1510_v10 = vpop.f32.mrb[5].mxu1 }
 0x1b2   : > { %v1463_v11 = vadd.f32 %v1462_v8, %v1461_v5  ;;  %v1511_v12 = vadd.f32 %v1510_v10, %v1509_v6  ;;  %v1464_v13 = vpop.f32.mrb[6].mxu0  ;;  %v1512_v14 = vpop.f32.mrb[6].mxu1  ;;  %v352_v5 = vld [vmem:[#allocation2 + $0xc0] sm:$0xff] }
 0x1b3   : > { %v1465_v16 = vpop.f32.mrb[7].mxu0  ;;  %v1513_v18 = vpop.f32.mrb[7].mxu1 }
 0x1b4   : > { %v843_v19 = vadd.f32 %v1463_v11, %v330_v7  ;;  %v859_v20 = vadd.f32 %v1511_v12, %v346_v9  ;;  %v1466_v21 = vadd.f32 %v1465_v16, %v1464_v13  ;;  %v1514_v22 = vadd.f32 %v1513_v18, %v1512_v14  ;;  %v337_v11 = vld [vmem:[#allocation2 + $0x48] sm:$0xff] }
 0x1b5   : > { %v353_v13 = vld [vmem:[#allocation2 + $0xc8] sm:$0xff] }
 0x1b6   : > { %875 = vst [vmem:[#allocation2 + $0x10] sm:$0xff] %v843_v19  ;;  %891 = vst [vmem:[#allocation2 + $0x90] sm:$0xff] %v859_v20  ;;  %v844_v23 = vadd.f32 %v1466_v21, %v331_v15  ;;  %v860_v24 = vadd.f32 %v1514_v22, %v347_v17 }
 0x1b8   : > { %876 = vst [vmem:[#allocation2 + $0x18] sm:$0xff] %v844_v23  ;;  %892 = vst [vmem:[#allocation2 + $0x98] sm:$0xff] %v860_v24  ;;  %v1467_v25 = vpop.f32.mrb[8].mxu0  ;;  %v1515_v26 = vpop.f32.mrb[8].mxu1  ;;  %v338_v23 = vld [vmem:[#allocation2 + $0x50] sm:$0xff] }
 0x1b9   : > { %v1468_v28 = vpop.f32.mrb[9].mxu0  ;;  %v1516_v30 = vpop.f32.mrb[9].mxu1 }
 0x1ba   : > { %v1469_v31 = vadd.f32 %v1468_v28, %v1467_v25  ;;  %v1517_v32 = vadd.f32 %v1516_v30, %v1515_v26  ;;  %v1470_v33 = vpop.f32.mrb[10].mxu0  ;;  %v1518_v34 = vpop.f32.mrb[10].mxu1  ;;  %v354_v25 = vld [vmem:[#allocation2 + $0xd0] sm:$0xff] }
 0x1bb   : > { %v1471_v36 = vpop.f32.mrb[11].mxu0  ;;  %v1519_v38 = vpop.f32.mrb[11].mxu1 }
 0x1bc   : > { %v845_v39 = vadd.f32 %v1469_v31, %v332_v27  ;;  %v861_v40 = vadd.f32 %v1517_v32, %v348_v29  ;;  %v1472_v41 = vadd.f32 %v1471_v36, %v1470_v33  ;;  %v1520_v42 = vadd.f32 %v1519_v38, %v1518_v34  ;;  %v339_v31 = vld [vmem:[#allocation2 + $0x58] sm:$0xff] }
 0x1bd   : > { %v355_v33 = vld [vmem:[#allocation2 + $0xd8] sm:$0xff] }
 0x1be   : > { %877 = vst [vmem:[#allocation2 + $0x20] sm:$0xff] %v845_v39  ;;  %893 = vst [vmem:[#allocation2 + $0xa0] sm:$0xff] %v861_v40  ;;  %v846_v43 = vadd.f32 %v1472_v41, %v333_v35  ;;  %v862_v44 = vadd.f32 %v1520_v42, %v349_v37 }
 0x1c0   : > { %878 = vst [vmem:[#allocation2 + $0x28] sm:$0xff] %v846_v43  ;;  %894 = vst [vmem:[#allocation2 + $0xa8] sm:$0xff] %v862_v44  ;;  %v1473_v45 = vpop.f32.mrb[12].mxu0  ;;  %v1521_v46 = vpop.f32.mrb[12].mxu1  ;;  %v340_v43 = vld [vmem:[#allocation2 + $0x60] sm:$0xff] }
 0x1c1   : > { %v1474_v48 = vpop.f32.mrb[13].mxu0  ;;  %v1522_v50 = vpop.f32.mrb[13].mxu1 }
 0x1c2   : > { %v1475_v51 = vadd.f32 %v1474_v48, %v1473_v45  ;;  %v1523_v52 = vadd.f32 %v1522_v50, %v1521_v46  ;;  %v1476_v53 = vpop.f32.mrb[14].mxu0  ;;  %v1524_v54 = vpop.f32.mrb[14].mxu1  ;;  %v356_v45 = vld [vmem:[#allocation2 + $0xe0] sm:$0xff] }
 0x1c3   : > { %v1477_v56 = vpop.f32.mrb[15].mxu0  ;;  %v1525_v58 = vpop.f32.mrb[15].mxu1 }
 0x1c4   : > { %v847_v59 = vadd.f32 %v1475_v51, %v334_v47  ;;  %v863_v60 = vadd.f32 %v1523_v52, %v350_v49  ;;  %v1478_v61 = vadd.f32 %v1477_v56, %v1476_v53  ;;  %v1526_v62 = vadd.f32 %v1525_v58, %v1524_v54  ;;  %v341_v51 = vld [vmem:[#allocation2 + $0x68] sm:$0xff] }
 0x1c5   : > { %v357_v53 = vld [vmem:[#allocation2 + $0xe8] sm:$0xff] }
 0x1c6   : > { %879 = vst [vmem:[#allocation2 + $0x30] sm:$0xff] %v847_v59  ;;  %895 = vst [vmem:[#allocation2 + $0xb0] sm:$0xff] %v863_v60  ;;  %v848_v63 = vadd.f32 %v1478_v61, %v335_v55  ;;  %v864_v0 = vadd.f32 %v1526_v62, %v351_v57 }
 0x1c8   : > { %880 = vst [vmem:[#allocation2 + $0x38] sm:$0xff] %v848_v63  ;;  %896 = vst [vmem:[#allocation2 + $0xb8] sm:$0xff] %v864_v0  ;;  %v1479_v1 = vpop.f32.mrb[16].mxu0  ;;  %v1527_v2 = vpop.f32.mrb[16].mxu1  ;;  %v342_v63 = vld [vmem:[#allocation2 + $0x70] sm:$0xff] }
 0x1c9   : > { %v1480_v4 = vpop.f32.mrb[17].mxu0  ;;  %v1528_v6 = vpop.f32.mrb[17].mxu1 }
 0x1ca   : > { %v1481_v7 = vadd.f32 %v1480_v4, %v1479_v1  ;;  %v1529_v8 = vadd.f32 %v1528_v6, %v1527_v2  ;;  %v1482_v9 = vpop.f32.mrb[18].mxu0  ;;  %v1530_v10 = vpop.f32.mrb[18].mxu1  ;;  %v358_v1 = vld [vmem:[#allocation2 + $0xf0] sm:$0xff] }
 0x1cb   : > { %v1483_v12 = vpop.f32.mrb[19].mxu0  ;;  %v1531_v14 = vpop.f32.mrb[19].mxu1 }
 0x1cc   : > { %v849_v15 = vadd.f32 %v1481_v7, %v336_v3  ;;  %v865_v16 = vadd.f32 %v1529_v8, %v352_v5  ;;  %v1484_v17 = vadd.f32 %v1483_v12, %v1482_v9  ;;  %v1532_v18 = vadd.f32 %v1531_v14, %v1530_v10  ;;  %v343_v7 = vld [vmem:[#allocation2 + $0x78] sm:$0xff] }
 0x1cd   : > { %v359_v9 = vld [vmem:[#allocation2 + $0xf8] sm:$0xff] }
 0x1ce   : > { %881 = vst [vmem:[#allocation2 + $0x40] sm:$0xff] %v849_v15  ;;  %897 = vst [vmem:[#allocation2 + $0xc0] sm:$0xff] %v865_v16  ;;  %v850_v19 = vadd.f32 %v1484_v17, %v337_v11  ;;  %v866_v20 = vadd.f32 %v1532_v18, %v353_v13  ;;  %v1869_v17 = vld [vmem:[#allocation8] sm:$0xff] (!%p1421_p5)   ;;  %v1870_v18 = vld [vmem:[#allocation8 + $0x8] sm:$0xff] (!%p1421_p5)  }
 0x1cf   : > { %1575 = vmatprep.subr.bf16.mxu0 (!%p1421_p5), %v1869_v17  ;;  %1639 = vmatprep.subr.bf16.mxu1 (!%p1421_p5), %v1869_v17 }
 0x1d0   : > { %882 = vst [vmem:[#allocation2 + $0x48] sm:$0xff] %v850_v19  ;;  %898 = vst [vmem:[#allocation2 + $0xc8] sm:$0xff] %v866_v20  ;;  %v1485_v21 = vpop.f32.mrb[20].mxu0  ;;  %v1533_v22 = vpop.f32.mrb[20].mxu1  ;;  %1576 = vmatpush3.bf16.msra.mxu0 (!%p1421_p5), %v1869_v17  ;;  %1647 = vmatpush3.bf16.msra.mxu1 (!%p1421_p5), %v1869_v17  ;;  %v1871_v19 = vld [vmem:[#allocation8 + $0x10] sm:$0xff] (!%p1421_p5)   ;;  %v1872_v20 = vld [vmem:[#allocation8 + $0x18] sm:$0xff] (!%p1421_p5)  }
 0x1d1   : > { %v1486_v24 = vpop.f32.mrb[21].mxu0  ;;  %v1534_v26 = vpop.f32.mrb[21].mxu1  ;;  %1577 = vmatprep.subr.bf16.mxu0 (!%p1421_p5), %v1870_v18  ;;  %1640 = vmatprep.subr.bf16.mxu1 (!%p1421_p5), %v1870_v18 }
 0x1d2   : > { %v1487_v27 = vadd.f32 %v1486_v24, %v1485_v21  ;;  %v1535_v28 = vadd.f32 %v1534_v26, %v1533_v22  ;;  %v1488_v29 = vpop.f32.mrb[22].mxu0  ;;  %v1536_v30 = vpop.f32.mrb[22].mxu1  ;;  %v909_v21 = vld [vmem:[#allocation2] sm:$0xff] (!%p1421_p5)  ;;  %v910_v22 = vld [vmem:[#allocation2 + $0x8] sm:$0xff] (!%p1421_p5) }
 0x1d3   : > { %v1489_v32 = vpop.f32.mrb[23].mxu0  ;;  %v1537_v34 = vpop.f32.mrb[23].mxu1  ;;  %v941_v24 = vpack.c.bf16 (!%p1421_p5), %v910_v22, %v909_v21 }
 0x1d4   : > { %v851_v35 = vadd.f32 %v1487_v27, %v338_v23  ;;  %v867_v36 = vadd.f32 %v1535_v28, %v354_v25  ;;  %v1490_v37 = vadd.f32 %v1489_v32, %v1488_v29  ;;  %v1538_v38 = vadd.f32 %v1537_v34, %v1536_v30  ;;  %1578 = vmatpush3.bf16.msra.mxu0 (!%p1421_p5), %v1870_v18  ;;  %v925_v23 = vld [vmem:[#allocation2 + $0x80] sm:$0xff] (!%p1421_p5)  ;;  %v926_v25 = vld [vmem:[#allocation2 + $0x88] sm:$0xff] (!%p1421_p5)  ;;  %v1875_v29 = vld [vmem:[#allocation8 + $0x30] sm:$0xff] (!%p1421_p5)  }
 0x1d5   : > { %1648 = vmatpush3.bf16.msra.mxu1 (!%p1421_p5), %v1870_v18  ;;  %1579 = vmatprep.subr.bf16.mxu0 (!%p1421_p5), %v1871_v19  ;;  %v949_v26 = vpack.c.bf16 (!%p1421_p5), %v926_v25, %v925_v23  ;;  %v1873_v27 = vld [vmem:[#allocation8 + $0x20] sm:$0xff] (!%p1421_p5)   ;;  %v1874_v28 = vld [vmem:[#allocation8 + $0x28] sm:$0xff] (!%p1421_p5)   ;;  %v1876_v30 = vld [vmem:[#allocation8 + $0x38] sm:$0xff] (!%p1421_p5)  }
 0x1d6   : > { %883 = vst [vmem:[#allocation2 + $0x50] sm:$0xff] %v851_v35  ;;  %899 = vst [vmem:[#allocation2 + $0xd0] sm:$0xff] %v867_v36  ;;  %v852_v39 = vadd.f32 %v1490_v37, %v339_v31  ;;  %v868_v40 = vadd.f32 %v1538_v38, %v355_v33  ;;  %1641 = vmatprep.subr.bf16.mxu1 (!%p1421_p5), %v1871_v19  ;;  %1591 = vmatprep.mubr.bf16.mxu0 (!%p1421_p5), %v941_v24  ;;  %v911_v31 = vld [vmem:[#allocation2 + $0x10] sm:$0xff] (!%p1421_p5)  ;;  %v912_v32 = vld [vmem:[#allocation2 + $0x18] sm:$0xff] (!%p1421_p5) }
 0x1d7   : > { %1607 = vmatprep.mubr.bf16.mxu1 (!%p1421_p5), %v949_v26  ;;  %v927_v33 = vld [vmem:[#allocation2 + $0x90] sm:$0xff] (!%p1421_p5)  ;;  %v928_v34 = vld [vmem:[#allocation2 + $0x98] sm:$0xff] (!%p1421_p5)  ;;  %v913_v35 = vld [vmem:[#allocation2 + $0x20] sm:$0xff] (!%p1421_p5) }
 0x1d8   : > { %884 = vst [vmem:[#allocation2 + $0x58] sm:$0xff] %v852_v39  ;;  %900 = vst [vmem:[#allocation2 + $0xd8] sm:$0xff] %v868_v40  ;;  %v1491_v41 = vpop.f32.mrb[24].mxu0  ;;  %v1539_v42 = vpop.f32.mrb[24].mxu1  ;;  %1580 = vmatpush3.bf16.msra.mxu0 (!%p1421_p5), %v1871_v19  ;;  %v914_v36 = vld [vmem:[#allocation2 + $0x28] sm:$0xff] (!%p1421_p5)  ;;  %v929_v37 = vld [vmem:[#allocation2 + $0xa0] sm:$0xff] (!%p1421_p5)  ;;  %v942_v39 = vpack.c.bf16 (!%p1421_p5), %v912_v32, %v911_v31  ;;  %v950_v40 = vpack.c.bf16 (!%p1421_p5), %v928_v34, %v927_v33 }
 0x1d9   : > { %v1492_v44 = vpop.f32.mrb[25].mxu0  ;;  %v1540_v46 = vpop.f32.mrb[25].mxu1  ;;  %1649 = vmatpush3.bf16.msra.mxu1 (!%p1421_p5), %v1871_v19  ;;  %1581 = vmatprep.subr.bf16.mxu0 (!%p1421_p5), %v1872_v20  ;;  %v930_v38 = vld [vmem:[#allocation2 + $0xa8] sm:$0xff] (!%p1421_p5) }
 0x1da   : > { %v1493_v47 = vadd.f32 %v1492_v44, %v1491_v41  ;;  %v1541_v48 = vadd.f32 %v1540_v46, %v1539_v42  ;;  %v1494_v49 = vpop.f32.mrb[26].mxu0  ;;  %v1542_v50 = vpop.f32.mrb[26].mxu1  ;;  %1642 = vmatprep.subr.bf16.mxu1 (!%p1421_p5), %v1872_v20  ;;  %v943_v41 = vpack.c.bf16 (!%p1421_p5), %v914_v36, %v913_v35  ;;  %v951_v42 = vpack.c.bf16 (!%p1421_p5), %v930_v38, %v929_v37  ;;  %v916_v44 = vld [vmem:[#allocation2 + $0x38] sm:$0xff] (!%p1421_p5) }
 0x1db   : > { %v1495_v52 = vpop.f32.mrb[27].mxu0  ;;  %v1543_v54 = vpop.f32.mrb[27].mxu1  ;;  %v932_v46 = vld [vmem:[#allocation2 + $0xb8] sm:$0xff] (!%p1421_p5) }
 0x1dc   : > { %v853_v55 = vadd.f32 %v1493_v47, %v340_v43  ;;  %v869_v56 = vadd.f32 %v1541_v48, %v356_v45  ;;  %v1496_v57 = vadd.f32 %v1495_v52, %v1494_v49  ;;  %v1544_v58 = vadd.f32 %v1543_v54, %v1542_v50  ;;  %1582 = vmatpush3.bf16.msra.mxu0 (!%p1421_p5), %v1872_v20  ;;  %v915_v43 = vld [vmem:[#allocation2 + $0x30] sm:$0xff] (!%p1421_p5)  ;;  %v917_v47 = vld [vmem:[#allocation2 + $0x40] sm:$0xff] (!%p1421_p5)  ;;  %v918_v48 = vld [vmem:[#allocation2 + $0x48] sm:$0xff] (!%p1421_p5) }
 0x1dd   : > { %1650 = vmatpush3.bf16.msra.mxu1 (!%p1421_p5), %v1872_v20  ;;  %1583 = vmatprep.subr.bf16.mxu0 (!%p1421_p5), %v1873_v27  ;;  %v931_v45 = vld [vmem:[#allocation2 + $0xb0] sm:$0xff] (!%p1421_p5)  ;;  %v933_v49 = vld [vmem:[#allocation2 + $0xc0] sm:$0xff] (!%p1421_p5)  ;;  %v934_v50 = vld [vmem:[#allocation2 + $0xc8] sm:$0xff] (!%p1421_p5) }
 0x1de   : > { %885 = vst [vmem:[#allocation2 + $0x60] sm:$0xff] %v853_v55  ;;  %901 = vst [vmem:[#allocation2 + $0xe0] sm:$0xff] %v869_v56  ;;  %v854_v59 = vadd.f32 %v1496_v57, %v341_v51  ;;  %v870_v60 = vadd.f32 %v1544_v58, %v357_v53  ;;  %1643 = vmatprep.subr.bf16.mxu1 (!%p1421_p5), %v1873_v27  ;;  %v944_v51 = vpack.c.bf16 (!%p1421_p5), %v916_v44, %v915_v43  ;;  %v919_v55 = vld [vmem:[#allocation2 + $0x50] sm:$0xff] (!%p1421_p5) }
 0x1df   : > { %v952_v52 = vpack.c.bf16 (!%p1421_p5), %v932_v46, %v931_v45  ;;  %v945_v53 = vpack.c.bf16 (!%p1421_p5), %v918_v48, %v917_v47  ;;  %v953_v54 = vpack.c.bf16 (!%p1421_p5), %v934_v50, %v933_v49  ;;  %v920_v56 = vld [vmem:[#allocation2 + $0x58] sm:$0xff] (!%p1421_p5)  ;;  %v935_v57 = vld [vmem:[#allocation2 + $0xd0] sm:$0xff] (!%p1421_p5) }
 0x1e0   : > { %886 = vst [vmem:[#allocation2 + $0x68] sm:$0xff] %v854_v59  ;;  %902 = vst [vmem:[#allocation2 + $0xe8] sm:$0xff] %v870_v60  ;;  %v1497_v61 = vpop.f32.mrb[28].mxu0  ;;  %v1545_v62 = vpop.f32.mrb[28].mxu1  ;;  %1584 = vmatpush3.bf16.msra.mxu0 (!%p1421_p5), %v1873_v27  ;;  %v936_v58 = vld [vmem:[#allocation2 + $0xd8] sm:$0xff] (!%p1421_p5) }
 0x1e1   : > { %v1498_v0 = vpop.f32.mrb[29].mxu0  ;;  %v1546_v2 = vpop.f32.mrb[29].mxu1  ;;  %1651 = vmatpush3.bf16.msra.mxu1 (!%p1421_p5), %v1873_v27  ;;  %1585 = vmatprep.subr.bf16.mxu0 (!%p1421_p5), %v1874_v28 }
 0x1e2   : > { %v1499_v3 = vadd.f32 %v1498_v0, %v1497_v61  ;;  %v1547_v4 = vadd.f32 %v1546_v2, %v1545_v62  ;;  %v1500_v5 = vpop.f32.mrb[30].mxu0  ;;  %v1548_v6 = vpop.f32.mrb[30].mxu1  ;;  %908 = sbr.rel (%p1421_p5) target bundleno = 738 (0x2e2), region = 56  ;;  %1644 = vmatprep.subr.bf16.mxu1 (!%p1421_p5), %v1874_v28  ;;  %v954_v0 = vpack.c.bf16 (!%p1421_p5), %v936_v58, %v935_v57 }
 0x1e3   : > { %v1501_v8 = vpop.f32.mrb[31].mxu0  ;;  %v1549_v10 = vpop.f32.mrb[31].mxu1 }
 0x1e4   : > { %v855_v11 = vadd.f32 %v1499_v3, %v342_v63  ;;  %v871_v12 = vadd.f32 %v1547_v4, %v358_v1  ;;  %v1502_v13 = vadd.f32 %v1501_v8, %v1500_v5  ;;  %v1550_v14 = vadd.f32 %v1549_v10, %v1548_v6  ;;  %1586 = vmatpush3.bf16.msra.mxu0 (!%p1421_p5), %v1874_v28 }
 0x1e5   : > { %1652 = vmatpush3.bf16.msra.mxu1 (!%p1421_p5), %v1874_v28  ;;  %1587 = vmatprep.subr.bf16.mxu0 (!%p1421_p5), %v1875_v29  ;;  %v921_v59 = vld [vmem:[#allocation2 + $0x60] sm:$0xff] (!%p1421_p5)  ;;  %v946_v63 = vpack.c.bf16 (!%p1421_p5), %v920_v56, %v919_v55 }
 0x1e6   : > { %887 = vst [vmem:[#allocation2 + $0x70] sm:$0xff] %v855_v11  ;;  %903 = vst [vmem:[#allocation2 + $0xf0] sm:$0xff] %v871_v12  ;;  %v856_v15 = vadd.f32 %v1502_v13, %v343_v7  ;;  %v872_v16 = vadd.f32 %v1550_v14, %v359_v9  ;;  %1645 = vmatprep.subr.bf16.mxu1 (!%p1421_p5), %v1875_v29  ;;  %v937_v61 = vld [vmem:[#allocation2 + $0xe0] sm:$0xff] (!%p1421_p5) }
 0x1e7   : > { %v922_v60 = vld [vmem:[#allocation2 + $0x68] sm:$0xff] (!%p1421_p5)  ;;  %v2506_v9 = vld [vmem:[%s2724_s15] ss:$0 sm:$0xff] (!%p1421_p5) }
 0x1e8   : > { %888 = vst [vmem:[#allocation2 + $0x78] sm:$0xff] %v856_v15  ;;  %904 = vst [vmem:[#allocation2 + $0xf8] sm:$0xff] %v872_v16  ;;  %1588 = vmatpush3.bf16.msra.mxu0 (!%p1421_p5), %v1875_v29  ;;  %v938_v62 = vld [vmem:[#allocation2 + $0xe8] sm:$0xff] (!%p1421_p5)  ;;  %v947_v1 = vpack.c.bf16 (!%p1421_p5), %v922_v60, %v921_v59 }
 0x1e9   : > { %1653 = vmatpush3.bf16.msra.mxu1 %v1875_v29  ;;  %1589 = vmatprep.subr.bf16.mxu0 %v1876_v30  ;;  %v955_v2 = vpack.c.bf16 %v938_v62, %v937_v61 }
 0x1ea   : > { %1646 = vmatprep.subr.bf16.mxu1 %v1876_v30 }
 0x1ec   : > { %1590 = vmatpush3.bf16.msra.mxu0 %v1876_v30 }
 0x1ed   : > { %1654 = vmatpush3.bf16.msra.mxu1 %v1876_v30  ;;  %v923_v3 = vld [vmem:[#allocation2 + $0x70] sm:$0xff] }
 0x1ee   : > { %v939_v5 = vld [vmem:[#allocation2 + $0xf0] sm:$0xff] }
 0x1ef   : > { %1592 = vmatmul.mubr.bf16.vlgmr.msra.gmra.mrb[0].mxu0 %v942_v39  ;;  %v924_v4 = vld [vmem:[#allocation2 + $0x78] sm:$0xff] }
 0x1f0   : > { %1608 = vmatmul.mubr.bf16.vlgmr.msra.gmra.mrb[0].mxu1 %v950_v40  ;;  %1595 = vmatprep.mubr.bf16.mxu0 %v943_v41  ;;  %v940_v6 = vld [vmem:[#allocation2 + $0xf8] sm:$0xff]  ;;  %v948_v7 = vpack.c.bf16 %v924_v4, %v923_v3 }
 0x1f1   : > { %1611 = vmatprep.mubr.bf16.mxu1 %v951_v42  ;;  %v956_v8 = vpack.c.bf16 %v940_v6, %v939_v5 }
 0x1f7   : > { %1596 = vmatmul.mubr.bf16.gmra.mrb[4].mxu0 %v944_v51 }
 0x1f8   : > { %1612 = vmatmul.mubr.bf16.gmra.mrb[4].mxu1 %v952_v52  ;;  %1599 = vmatprep.mubr.bf16.mxu0 %v945_v53 }
 0x1f9   : > { %1615 = vmatprep.mubr.bf16.mxu1 %v953_v54 }
 0x1ff   : > { %1600 = vmatmul.mubr.bf16.gmra.mrb[8].mxu0 %v946_v63 }
 0x200   : > { %1616 = vmatmul.mubr.bf16.gmra.mrb[8].mxu1 %v954_v0  ;;  %1603 = vmatprep.mubr.bf16.mxu0 %v947_v1 }
 0x201   : > { %1619 = vmatprep.mubr.bf16.mxu1 %v955_v2 }
 0x207   : > { %1604 = vmatmul.mubr.bf16.gmra.mrb[12].mxu0 %v948_v7 }
 0x208   : > { %1620 = vmatmul.mubr.bf16.gmra.mrb[12].mxu1 %v956_v8 }
 0x2c2   : > { %v1593_v10 = vpop.f32.mrb[0].mxu0 }
 0x2c3   : > { %v1609_v11 = vpop.f32.mrb[0].mxu1  ;;  %v1071_v12 = vadd.f32 %v1593_v10, %v2506_v9  ;;  %v1062_v14 = vpop.f32.mrb[1].mxu0 }
 0x2c4   : > { %v1135_v13 = vadd.f32 %v1609_v11, %v2506_v9  ;;  %v1126_v15 = vpop.f32.mrb[1].mxu1  ;;  %v1063_v16 = vadd.f32 %v2506_v9, %v1062_v14  ;;  %v1594_v18 = vpop.f32.mrb[2].mxu0 }
 0x2c5   : > { %v1127_v17 = vadd.f32 %v2506_v9, %v1126_v15  ;;  %v1610_v19 = vpop.f32.mrb[2].mxu1  ;;  %1191 = vst [vmem:[%s2451_s9 + $0x10] sm:$0xff] %v1071_v12  ;;  %v1074_v20 = vadd.f32 %v1594_v18, %v2506_v9  ;;  %v1065_v22 = vpop.f32.mrb[3].mxu0 }
 0x2c6   : > { %1207 = vst [vmem:[%s2451_s9 + $0x90] sm:$0xff] %v1135_v13  ;;  %v1138_v21 = vadd.f32 %v1610_v19, %v2506_v9  ;;  %v1129_v23 = vpop.f32.mrb[3].mxu1  ;;  %1189 = vst [vmem:[%s2451_s9] sm:$0xff] %v1063_v16  ;;  %v1066_v24 = vadd.f32 %v2506_v9, %v1065_v22 }
 0x2c7   : > { %1205 = vst [vmem:[%s2451_s9 + $0x80] sm:$0xff] %v1127_v17  ;;  %v1130_v25 = vadd.f32 %v2506_v9, %v1129_v23  ;;  %1192 = vst [vmem:[%s2451_s9 + $0x18] sm:$0xff] %v1074_v20 }
 0x2c8   : > { %1208 = vst [vmem:[%s2451_s9 + $0x98] sm:$0xff] %v1138_v21  ;;  %1190 = vst [vmem:[%s2451_s9 + $0x8] sm:$0xff] %v1066_v24 }
 0x2c9   : > { %1206 = vst [vmem:[%s2451_s9 + $0x88] sm:$0xff] %v1130_v25 }
 0x2ca   : > { %v1597_v26 = vpop.f32.mrb[4].mxu0 }
 0x2cb   : > { %v1613_v27 = vpop.f32.mrb[4].mxu1  ;;  %v1087_v28 = vadd.f32 %v1597_v26, %v2506_v9  ;;  %v1078_v30 = vpop.f32.mrb[5].mxu0 }
 0x2cc   : > { %v1151_v29 = vadd.f32 %v1613_v27, %v2506_v9  ;;  %v1142_v31 = vpop.f32.mrb[5].mxu1  ;;  %v1079_v32 = vadd.f32 %v2506_v9, %v1078_v30  ;;  %v1598_v34 = vpop.f32.mrb[6].mxu0 }
 0x2cd   : > { %v1143_v33 = vadd.f32 %v2506_v9, %v1142_v31  ;;  %v1614_v35 = vpop.f32.mrb[6].mxu1  ;;  %1195 = vst [vmem:[%s2451_s9 + $0x30] sm:$0xff] %v1087_v28  ;;  %v1090_v36 = vadd.f32 %v1598_v34, %v2506_v9  ;;  %v1081_v38 = vpop.f32.mrb[7].mxu0 }
 0x2ce   : > { %1211 = vst [vmem:[%s2451_s9 + $0xb0] sm:$0xff] %v1151_v29  ;;  %v1154_v37 = vadd.f32 %v1614_v35, %v2506_v9  ;;  %v1145_v39 = vpop.f32.mrb[7].mxu1  ;;  %1193 = vst [vmem:[%s2451_s9 + $0x20] sm:$0xff] %v1079_v32  ;;  %v1082_v40 = vadd.f32 %v2506_v9, %v1081_v38 }
 0x2cf   : > { %1209 = vst [vmem:[%s2451_s9 + $0xa0] sm:$0xff] %v1143_v33  ;;  %v1146_v41 = vadd.f32 %v2506_v9, %v1145_v39  ;;  %1196 = vst [vmem:[%s2451_s9 + $0x38] sm:$0xff] %v1090_v36 }
 0x2d0   : > { %1212 = vst [vmem:[%s2451_s9 + $0xb8] sm:$0xff] %v1154_v37  ;;  %1194 = vst [vmem:[%s2451_s9 + $0x28] sm:$0xff] %v1082_v40 }
 0x2d1   : > { %1210 = vst [vmem:[%s2451_s9 + $0xa8] sm:$0xff] %v1146_v41 }
 0x2d2   : > { %v1601_v42 = vpop.f32.mrb[8].mxu0 }
 0x2d3   : > { %v1617_v43 = vpop.f32.mrb[8].mxu1  ;;  %v1103_v44 = vadd.f32 %v1601_v42, %v2506_v9  ;;  %v1094_v46 = vpop.f32.mrb[9].mxu0 }
 0x2d4   : > { %v1167_v45 = vadd.f32 %v1617_v43, %v2506_v9  ;;  %v1158_v47 = vpop.f32.mrb[9].mxu1  ;;  %v1095_v48 = vadd.f32 %v2506_v9, %v1094_v46  ;;  %v1602_v50 = vpop.f32.mrb[10].mxu0 }
 0x2d5   : > { %v1159_v49 = vadd.f32 %v2506_v9, %v1158_v47  ;;  %v1618_v51 = vpop.f32.mrb[10].mxu1  ;;  %1199 = vst [vmem:[%s2451_s9 + $0x50] sm:$0xff] %v1103_v44  ;;  %v1106_v52 = vadd.f32 %v1602_v50, %v2506_v9  ;;  %v1097_v54 = vpop.f32.mrb[11].mxu0 }
 0x2d6   : > { %1215 = vst [vmem:[%s2451_s9 + $0xd0] sm:$0xff] %v1167_v45  ;;  %v1170_v53 = vadd.f32 %v1618_v51, %v2506_v9  ;;  %v1161_v55 = vpop.f32.mrb[11].mxu1  ;;  %1197 = vst [vmem:[%s2451_s9 + $0x40] sm:$0xff] %v1095_v48  ;;  %v1098_v56 = vadd.f32 %v2506_v9, %v1097_v54 }
 0x2d7   : > { %1213 = vst [vmem:[%s2451_s9 + $0xc0] sm:$0xff] %v1159_v49  ;;  %v1162_v57 = vadd.f32 %v2506_v9, %v1161_v55  ;;  %1200 = vst [vmem:[%s2451_s9 + $0x58] sm:$0xff] %v1106_v52 }
 0x2d8   : > { %1216 = vst [vmem:[%s2451_s9 + $0xd8] sm:$0xff] %v1170_v53  ;;  %1198 = vst [vmem:[%s2451_s9 + $0x48] sm:$0xff] %v1098_v56 }
 0x2d9   : > { %1214 = vst [vmem:[%s2451_s9 + $0xc8] sm:$0xff] %v1162_v57 }
 0x2da   : > { %v1605_v58 = vpop.f32.mrb[12].mxu0 }
 0x2db   : > { %v1621_v59 = vpop.f32.mrb[12].mxu1  ;;  %v1119_v60 = vadd.f32 %v1605_v58, %v2506_v9  ;;  %v1110_v62 = vpop.f32.mrb[13].mxu0 }
 0x2dc   : > { %v1183_v61 = vadd.f32 %v1621_v59, %v2506_v9  ;;  %v1174_v63 = vpop.f32.mrb[13].mxu1  ;;  %v1111_v0 = vadd.f32 %v2506_v9, %v1110_v62  ;;  %v1606_v2 = vpop.f32.mrb[14].mxu0 }
 0x2dd   : > { %v1175_v1 = vadd.f32 %v2506_v9, %v1174_v63  ;;  %v1622_v3 = vpop.f32.mrb[14].mxu1  ;;  %1203 = vst [vmem:[%s2451_s9 + $0x70] sm:$0xff] %v1119_v60  ;;  %v1122_v4 = vadd.f32 %v1606_v2, %v2506_v9  ;;  %v1113_v6 = vpop.f32.mrb[15].mxu0 }
 0x2de   : > { %1219 = vst [vmem:[%s2451_s9 + $0xf0] sm:$0xff] %v1183_v61  ;;  %v1186_v5 = vadd.f32 %v1622_v3, %v2506_v9  ;;  %v1177_v7 = vpop.f32.mrb[15].mxu1  ;;  %1201 = vst [vmem:[%s2451_s9 + $0x60] sm:$0xff] %v1111_v0  ;;  %v1114_v8 = vadd.f32 %v2506_v9, %v1113_v6 }
 0x2df   : > { %1217 = vst [vmem:[%s2451_s9 + $0xe0] sm:$0xff] %v1175_v1  ;;  %v1178_v10 = vadd.f32 %v2506_v9, %v1177_v7  ;;  %1204 = vst [vmem:[%s2451_s9 + $0x78] sm:$0xff] %v1122_v4 }
 0x2e0   : > { %1220 = vst [vmem:[%s2451_s9 + $0xf8] sm:$0xff] %v1186_v5  ;;  %1202 = vst [vmem:[%s2451_s9 + $0x68] sm:$0xff] %v1114_v8 }
 0x2e1   : > { %1218 = vst [vmem:[%s2451_s9 + $0xe8] sm:$0xff] %v1178_v10 }
 0x2e2 PF: > { %s2725_s14 = sld [smem:[#allocation17_spill]]  ;;  %s2727_s13 = sld [smem:[#allocation20_spill]] }
 0x2e3   : > { %s2728_s21 = sld [smem:[#allocation26_spill]]  ;;  %s1235_s6 = sshll.u32 %s2451_s9, 4  ;;  %s2579_s6 = int_to_ptr.vmem [resolvable:$true] %s1235_s6 }
 0x2e4   : > { %s2583_s5 = scalar_lea.sflag [#allocation5], %s284_s16  ;;  %s1965_s30 = scalar_lea.vmem %s2579_s6, 4096 }
 0x2e5   : > { %p1966_p2 = scmp.ne.s32.totalorder %s2579_s6, %s1965_s30  ;;  %s2130_s12 = smov [#allocation9]  }
 0x2e6   : > { %s1969_s24 = sshll.u32 %s2130_s12, 4  ;;  %s1970_s24 = int_to_ptr.vmem [resolvable:$false] %s1969_s24 }
 0x2e7   : > { %s1971_s3 = scalar_lea.vmem %s1970_s24, 8192  ;;  %p1972_p4 = scmp.lt.s32.totalorder %s2579_s6, %s1970_s24 }
 0x2e8   : > { %s1438_s29 = sshll.u32 %s2725_s14, 12  ;;  %p2730_p10 = scmp.ne.s32.totalorder %s2727_s13, 0 }
 0x2e9   : > { %s2729_s10 = smov %s2728_s21  ;;  %s2576_s2 = scalar_lea.hbm %s2728_s21, %s1438_s29 }
 0x2ea   : > { %p1967_p7 = pnand %p1966_p2, %p2730_p10  ;;  %p1973_p8 = scmp.lt.s32.totalorder %s1971_s3, %s1965_s30 }
 0x2ec   : > { %p1968_p11 = pneg %p1967_p7  ;;  %p1974_p12 = por %p1973_p8, %p1972_p4 }
 0x2ee   : > { %p1975_p13 = pnand %p1974_p12, %p1968_p11 }
 0x2f0   : > { %1978 = shalt.err (!%p1975_p13)
}
 0x2f1   : > { %s1979_s16 = scalar_lea.hbm %s2576_s2, 4096  ;;  %s1983_s14 = scalar_lea.hbm %s2729_s10, 8192 }
 0x2f2   : > { %p1980_p6 = scmp.ne.s32.totalorder %s2576_s2, %s1979_s16  ;;  %p1984_p3 = scmp.lt.u32.totalorder %s2576_s2, %s2729_s10 }
 0x2f3   : > { %p1985_p9 = scmp.lt.u32.totalorder %s1983_s14, %s1979_s16  ;;  %p1987_p2 = scmp.lt.u32.totalorder %s1979_s16, %s2576_s2 }
 0x2f4   : > { %p1981_p0 = pnand %p1980_p6, %p2730_p10 }
 0x2f5   : > { %p1986_p5 = por %p1985_p9, %p1984_p3 }
 0x2f6   : > { %p1982_p1 = pneg %p1981_p0 }
 0x2f7   : > { %p1988_p7 = por %p1987_p2, %p1986_p5 }
 0x2f9   : > { %p1989_p11 = pnand %p1988_p7, %p1982_p1 }
 0x2fb   : > { %1992 = shalt.err (!%p1989_p11)
}
 0x2fc   : > { %s2131_s8 = smov 128   ;;  %s2132_s11 = smov 8  }
 0x2fd   : > { %1663 = dma.vmem_to_hbm [thread:$0]  (%p2730_p10), %s2579_s6, 4096, %s2576_s2, %s2583_s5, %s2131_s8, %s2131_s8, %s2132_s11  }
 0x2fe PF: > { %s2731_s21 = sld [smem:[#allocation14_spill]]  ;;  %s2732_s30 = sld [smem:[#allocation21_spill]] }
 0x2ff   : > { %p1683_p4 = scmp.ge.s32.totalorder %s2119_s28, 2 }
 0x304   : > { %s1250_s12 = sand.u32 1, %s2731_s21   ;;  %p2733_p8 = scmp.ne.s32.totalorder %s2732_s30, 0 }
 0x305   : > { %s1251_s24 = scalar_lea.sflag [#allocation5], %s1250_s12 }
 0x306   : > { %p1677_p12 = pnand %p1683_p4, %p2733_p8 }
 0x308   : > { %2062 = dma.done.wait (!%p1677_p12), %s1251_s24, 4096  }
 0x309   : > { %2064 = vsyncadd (!%p1677_p12), %s1251_s24, 4294963200  ;;  %s23_s28 = sadd.s32 1, %s2119_s28   ;;  %s2735_s15 = sld [smem:[#allocation15_spill]] }
 0x30a   : > { %p2612_p13 = scmp.ge.s32.totalorder %s23_s28, 6   ;;  %s2736_s13 = sld [smem:[#allocation22_spill]] }
 0x30b   : > { %s2737_s2 = sld [smem:[#allocation23_spill]]  ;;  %s2738_s16 = smov %s2075_s17 }
 0x30c   : > { %s2739_s17 = smov %s2321_s18  ;;  %s2740_s18 = smov %s2083_s19 }
 0x30d   : > { %s2741_s19 = smov %s2087_s20  ;;  %s2742_s20 = smov %s2377_s7 }
 0x30e   : > { %s2743_s21 = smov %s2095_s22  ;;  %s2744_s22 = smov %s2099_s23 }
 0x30f   : > { %s2745_s23 = smov %s2324_s4  ;;  %s2746_s24 = smov %s2111_s26 }
 0x310   : > { %s2747_s25 = smov %s2115_s27  ;;  %s2748_s26 = smov %s2736_s13 }
 0x311   : > { %s2749_s27 = smov %s2737_s2  ;;  %22 = sbr.rel (!%p2612_p13) target bundleno = 16 (0x10), region = 106 }
 0x318   :  { %1256 = vsyncpa [#allocation4], 1 }
 0x319   :  { %1258 = vsyncpa [#allocation4 + $0x1], 1 }
 0x31a   :  { %1259 = vsyncpa [#allocation7], 1 }
 0x31b   :  { %1261 = vsyncpa [#allocation7 + $0x1], 1 }
 0x31c   :  { %1262 = vsyncpa [#allocation5], 1 }
 0x31d   :  { %1264 = vsyncpa [#allocation5 + $0x1], 1 }

</bundles_post_ra>
